<compile_context>
chip_gen: v5e
topology: v5e:2x2
jax: 0.10.0
libtpu: 0.0.40
codegen_flags: <defaults>
</compile_context>

<pallas_src>
import functools

import jax
import jax.numpy as jnp
from jax import lax
from jax.experimental import pallas as pl
from jax.experimental.pallas import tpu as pltpu


_NEG = -1e30  # finite "-inf" stand-in (avoids inf arithmetic inside the kernel)


def _cluster_eval_kernel(
    img_ref,        # (1, C_in, TN) f32   channels on sublanes, pixels on lanes
    lbl_ref,        # (1, 1, TN)    i32
    wp_ref,         # (D, C_in)     f32   backbone 1x1-conv weight (transposed)
    bp_ref,         # (D, 1)        f32
    wc_ref,         # (K+KE, D)     f32   [linear-probe W^T ; normalized clusters]
    bc_ref,         # (K+KE, 1)     f32   [linear-probe bias ; zeros]
    lin_pred_ref,   # (1, 1, TN)    i32
    clus_pred_ref,  # (1, 1, TN)    i32
    ce_sum_ref,     # (1, 1, 1)     f32   per-batch CE sum over valid pixels
    cnt_ref,        # (1, 1, 1)     f32   per-batch valid-pixel count
    closs_ref,      # (1, 1, 1)     f32   per-batch sum of -max inner product
    *,
    num_classes,
):
    s = pl.program_id(1)  # spatial tile index (reduction axis for accumulators)

    @pl.when(s == 0)
    def _():
        ce_sum_ref[...] = jnp.zeros_like(ce_sum_ref)
        cnt_ref[...] = jnp.zeros_like(cnt_ref)
        closs_ref[...] = jnp.zeros_like(closs_ref)

    x = img_ref[0]                                               # (C_in, TN)

    # Synthetic backbone: pointwise projection to hidden_dim (semantic_feat).
    feat = jnp.dot(wp_ref[...], x, preferred_element_type=jnp.float32)
    feat = feat + bp_ref[...]                                    # (D, TN)

    # Fused probe matmul: one (K+KE, D) @ (D, TN) MXU dot for both probes.
    comb = jnp.dot(wc_ref[...], feat, preferred_element_type=jnp.float32)
    comb = comb + bc_ref[...]                                    # (KC, TN)
    kc = comb.shape[0]
    k = num_classes
    cls_iota = lax.broadcasted_iota(jnp.int32, comb.shape, 0)    # shared row-index iota
    lin_rows = cls_iota < k

    # ---- linear probe: argmax + pixel-wise CE (labels outside [0,K) ignored) ----
    logits = jnp.where(lin_rows, comb, _NEG)                     # (KC, TN)
    row_max = jnp.max(logits, axis=0, keepdims=True)             # (1, TN)
    lin_pred = jnp.min(
        jnp.where(logits == row_max, cls_iota, kc), axis=0, keepdims=True
    ).astype(jnp.int32)                                          # (1, TN)
    lin_pred_ref[0] = lin_pred

    lbl = lbl_ref[0]                                             # (1, TN)
    lse = row_max + jnp.log(
        jnp.sum(jnp.exp(logits - row_max), axis=0, keepdims=True))
    picked = jnp.sum(jnp.where(cls_iota == lbl, comb, 0.0), axis=0, keepdims=True)
    valid = jnp.logical_and(lbl >= 0, lbl < k).astype(jnp.float32)
    ce = (lse - picked) * valid
    ce_sum_ref[...] += jnp.sum(ce).reshape(1, 1, 1)
    cnt_ref[...] += jnp.sum(valid).reshape(1, 1, 1)

    # ---- cluster (kmeans) probe ----
    # normalize(feat) . c_norm == (feat . c_norm) * 1/||feat||, so the argmax uses
    # the raw dot and only the max needs the (positive) per-pixel rescale.
    inv_norm = lax.rsqrt(jnp.sum(feat * feat, axis=0, keepdims=True) + 1e-12)
    raw = jnp.where(lin_rows, _NEG, comb)                        # cluster rows only
    rmax = jnp.max(raw, axis=0, keepdims=True)                   # (1, TN)
    clus_pred = jnp.min(
        jnp.where(raw == rmax, cls_iota - k, kc), axis=0, keepdims=True
    ).astype(jnp.int32)
    clus_pred_ref[0] = clus_pred
    closs_ref[...] += (-jnp.sum(rmax * inv_norm)).reshape(1, 1, 1)


@functools.partial(jax.jit, static_argnames=("tile_n",))
def cluster_wrapper_forward(img, label, params, tile_n=None):
    """img: (B, C_in, H, W) f32 (NCHW, matching the PyTorch reference).
       label: (B, H, W) i32 (values outside [0, num_classes) are ignored).
       Returns (total_loss, output_dict, (linear_preds, cluster_preds))."""
    B, C_in, H, W = img.shape
    HW = H * W
    N = B * HW

    if tile_n is None:  # largest lane-dense tile that evenly divides the row
        tile_n = 128
        for cand in (2048, 1024, 512, 256, 128):
            if HW % cand == 0:
                tile_n = cand
                break
    assert tile_n % 128 == 0 and HW % tile_n == 0, \
        "H*W must be a multiple of a 128-aligned tile_n for this demo"

    # Free reshapes only — no NCHW->NHWC transpose, no extra HBM round trip.
    img_r = img.reshape(B, C_in, HW).astype(jnp.float32)
    lbl_r = label.reshape(B, 1, HW).astype(jnp.int32)

    w_proj = params["w_proj"].astype(jnp.float32)      # (C_in, D)
    b_proj = params["b_proj"].astype(jnp.float32)      # (D,)
    w_lin = params["w_lin"].astype(jnp.float32)        # (D, K)
    b_lin = params["b_lin"].astype(jnp.float32)        # (K,)
    clusters = params["clusters"].astype(jnp.float32)  # (KE, D)

    D = w_proj.shape[1]
    K = w_lin.shape[1]
    KE = clusters.shape[0]
    KC = K + KE

    # F.normalize(clusters, dim=1); fuse linear-probe weight and cluster centers
    # into a single (K+KE, D) matrix (and a fused bias with zeros for clusters).
    c_norm = clusters * lax.rsqrt(
        jnp.sum(clusters * clusters, axis=1, keepdims=True) + 1e-12)
    wp_t = jnp.transpose(w_proj)                                  # (D, C_in)
    bp = b_proj.reshape(D, 1)
    wc = jnp.concatenate([jnp.transpose(w_lin), c_norm], axis=0)  # (KC, D)
    bc = jnp.concatenate(
        [b_lin, jnp.zeros((KE,), jnp.float32)], axis=0).reshape(KC, 1)

    grid = (B, HW // tile_n)
    kernel = functools.partial(_cluster_eval_kernel, num_classes=K)

    out_shapes = (
        jax.ShapeDtypeStruct((B, 1, HW), jnp.int32),    # linear preds (lane-dense)
        jax.ShapeDtypeStruct((B, 1, HW), jnp.int32),    # cluster preds (lane-dense)
        jax.ShapeDtypeStruct((B, 1, 1), jnp.float32),   # per-batch CE sum
        jax.ShapeDtypeStruct((B, 1, 1), jnp.float32),   # per-batch valid count
        jax.ShapeDtypeStruct((B, 1, 1), jnp.float32),   # per-batch cluster loss sum
    )

    grid_spec = pltpu.PrefetchScalarGridSpec(
        num_scalar_prefetch=0,
        grid=grid,
        in_specs=[
            pl.BlockSpec((1, C_in, tile_n), lambda b, s: (b, 0, s)),
            pl.BlockSpec((1, 1, tile_n), lambda b, s: (b, 0, s)),
            pl.BlockSpec((D, C_in), lambda b, s: (0, 0)),
            pl.BlockSpec((D, 1), lambda b, s: (0, 0)),
            pl.BlockSpec((KC, D), lambda b, s: (0, 0)),
            pl.BlockSpec((KC, 1), lambda b, s: (0, 0)),
        ],
        out_specs=[
            pl.BlockSpec((1, 1, tile_n), lambda b, s: (b, 0, s)),
            pl.BlockSpec((1, 1, tile_n), lambda b, s: (b, 0, s)),
            pl.BlockSpec((1, 1, 1), lambda b, s: (b, 0, 0)),
            pl.BlockSpec((1, 1, 1), lambda b, s: (b, 0, 0)),
            pl.BlockSpec((1, 1, 1), lambda b, s: (b, 0, 0)),
        ],
    )

    lin_preds, clus_preds, ce_sum, cnt, closs = pl.pallas_call(
        kernel,
        out_shape=out_shapes,
        grid_spec=grid_spec,
        compiler_params=pltpu.CompilerParams(
            # batch axis parallel (v7x megacore: each core owns its own per-batch
            # accumulator blocks); spatial axis is the accumulator reduction axis.
            dimension_semantics=("parallel", "arbitrary"),
            # explicit scoped-VMEM budget so larger tile_n also fits v5e's
            # 16 MiB default (actual usage is far below this).
            vmem_limit_bytes=32 * 1024 * 1024,
        ),
    )(img_r, lbl_r, wp_t, bp, wc, bc)

    linear_loss = jnp.sum(ce_sum) / jnp.maximum(jnp.sum(cnt), 1.0)
    cluster_loss = jnp.sum(closs) / jnp.float32(N)

    model_loss = jnp.zeros((1,), jnp.float32)  # contra_pos_weight defaults to 0.0
    total_loss = model_loss + linear_loss + cluster_loss

    linear_preds = lin_preds.reshape(B, H, W)
    cluster_preds = clus_preds.reshape(B, H, W)

    output = {
        "linear-loss": linear_loss,
        "cluster-loss": cluster_loss,
    }
    return total_loss, output, (linear_preds, cluster_preds)


def _reference(img, label, params):
    """Pure-JAX reference matching the PyTorch semantics (sanity check)."""
    B, C_in, H, W = img.shape
    x = jnp.transpose(img, (0, 2, 3, 1)).reshape(-1, C_in).astype(jnp.float32)
    lbl = label.reshape(-1)
    feat = x @ params["w_proj"] + params["b_proj"]
    logits = feat @ params["w_lin"] + params["b_lin"]
    K = logits.shape[-1]
    lin_preds = jnp.argmax(logits, axis=-1).astype(jnp.int32)
    lse = jax.scipy.special.logsumexp(logits, axis=-1)
    picked = jnp.take_along_axis(
        logits, jnp.clip(lbl, 0, K - 1)[:, None], axis=-1)[:, 0]
    valid = jnp.logical_and(lbl >= 0, lbl < K)
    ce = jnp.where(valid, lse - picked, 0.0)
    lin_loss = jnp.sum(ce) / jnp.maximum(jnp.sum(valid.astype(jnp.float32)), 1.0)

    c = params["clusters"]
    cn = c * lax.rsqrt(jnp.sum(c * c, axis=1, keepdims=True) + 1e-12)
    inv_norm = lax.rsqrt(jnp.sum(feat * feat, axis=-1, keepdims=True) + 1e-12)
    # == F.normalize(feat, dim=-1) @ cn.T (per-pixel positive rescale of the raw dot)
    inner = (feat @ cn.T) * inv_norm
    clus_preds = jnp.argmax(inner, axis=-1).astype(jnp.int32)
    clus_loss = -jnp.mean(jnp.max(inner, axis=-1))
    total = lin_loss + clus_loss
    return (total, lin_loss, clus_loss,
            lin_preds.reshape(B, H, W), clus_preds.reshape(B, H, W))


if __name__ == "__main__":
    # Small shapes implied by the module config: hidden_dim=32, num_classes=4,
    # extra_classes=1; image batch=2, 3 channels, 16x16 spatial.
    B, C_in, H, W = 2, 3, 16, 16
    hidden_dim = 32
    num_classes = 4
    extra_classes = 1

    key = jax.random.PRNGKey(0)
    k_img, k_lbl, k1, k2, k3, k4, k5 = jax.random.split(key, 7)

    img = jax.random.normal(k_img, (B, C_in, H, W), jnp.float32)
    # labels in [-1, num_classes): -1 acts as ignore-index
    label = jax.random.randint(k_lbl, (B, H, W), -1, num_classes, jnp.int32)

    params = {
        "w_proj": 0.1 * jax.random.normal(k1, (C_in, hidden_dim), jnp.float32),
        "b_proj": 0.01 * jax.random.normal(k2, (hidden_dim,), jnp.float32),
        "w_lin": 0.1 * jax.random.normal(k3, (hidden_dim, num_classes), jnp.float32),
        "b_lin": 0.01 * jax.random.normal(k4, (num_classes,), jnp.float32),
        "clusters": jax.random.normal(
            k5, (num_classes + extra_classes, hidden_dim), jnp.float32),
    }

    total_loss, output, (lin_preds, clus_preds) = cluster_wrapper_forward(
        img, label, params)
    jax.block_until_ready((total_loss, output, lin_preds, clus_preds))

    # sanity check against a pure-JAX reference
    ref_total, ref_lin, ref_clus, ref_lp, ref_cp = _reference(img, label, params)
    assert jnp.allclose(output["linear-loss"], ref_lin, rtol=1e-4, atol=1e-4)
    assert jnp.allclose(output["cluster-loss"], ref_clus, rtol=1e-4, atol=1e-4)
    assert jnp.allclose(total_loss[0], ref_total, rtol=1e-4, atol=1e-4)
    assert jnp.array_equal(lin_preds, ref_lp)
    assert jnp.array_equal(clus_preds, ref_cp)

    print("KERNEL_OK")
</pallas_src>

<mosaic_0001>
module attributes {stable_mosaic.version = 11 : i64} {
  func.func @_cluster_eval_kernel(%arg0: i32, %arg1: i32, %arg2: memref<1x3x256xf32, #tpu.memory_space<vmem>>, %arg3: memref<1x1x256xi32, #tpu.memory_space<vmem>>, %arg4: memref<32x3xf32, #tpu.memory_space<vmem>>, %arg5: memref<32x1xf32, #tpu.memory_space<vmem>>, %arg6: memref<9x32xf32, #tpu.memory_space<vmem>>, %arg7: memref<9x1xf32, #tpu.memory_space<vmem>>, %arg8: memref<1x1x256xi32, #tpu.memory_space<vmem>>, %arg9: memref<1x1x256xi32, #tpu.memory_space<vmem>>, %arg10: memref<1x1x1xf32, #tpu.memory_space<vmem>>, %arg11: memref<1x1x1xf32, #tpu.memory_space<vmem>>, %arg12: memref<1x1x1xf32, #tpu.memory_space<vmem>>) attributes {dimension_semantics = [#tpu.dimension_semantics<parallel>, #tpu.dimension_semantics<arbitrary>], iteration_bounds = array<i64: 2, 1>, scalar_prefetch = 0 : i64, scratch_operands = 0 : i64, tpu.core_type = #tpu.core_type<tc>, window_params = [{transform_indices = @transform_0, window_bounds = array<i64: 1, 3, 256>}, {transform_indices = @transform_1, window_bounds = array<i64: 1, 1, 256>}, {pipeline_mode = #tpu.pipeline_mode<synchronous>, transform_indices = @transform_2, window_bounds = array<i64: 32, 3>}, {pipeline_mode = #tpu.pipeline_mode<synchronous>, transform_indices = @transform_3, window_bounds = array<i64: 32, 1>}, {pipeline_mode = #tpu.pipeline_mode<synchronous>, transform_indices = @transform_4, window_bounds = array<i64: 9, 32>}, {pipeline_mode = #tpu.pipeline_mode<synchronous>, transform_indices = @transform_5, window_bounds = array<i64: 9, 1>}, {transform_indices = @transform_6, window_bounds = array<i64: 1, 1, 256>}, {transform_indices = @transform_7, window_bounds = array<i64: 1, 1, 256>}, {transform_indices = @transform_8, window_bounds = array<i64: 1, 1, 1>}, {transform_indices = @transform_9, window_bounds = array<i64: 1, 1, 1>}, {transform_indices = @transform_10, window_bounds = array<i64: 1, 1, 1>}]} {
    %c0_i32 = arith.constant 0 : i32
    %0 = arith.cmpi eq, %arg1, %c0_i32 : i32
    %1 = arith.extui %0 : i1 to i32
    %c0_i32_0 = arith.constant 0 : i32
    %2 = arith.cmpi ne, %1, %c0_i32_0 : i32
    scf.if %2 {
      %cst_58 = arith.constant 0.000000e+00 : f32
      %102 = vector.broadcast %cst_58 : f32 to vector<1x1x1xf32>
      %c0_59 = arith.constant 0 : index
      %c0_60 = arith.constant 0 : index
      %c0_61 = arith.constant 0 : index
      %103 = vector.load %arg10[%c0_59, %c0_60, %c0_61] : memref<1x1x1xf32, #tpu.memory_space<vmem>>, vector<1x1x1xf32>
      tpu.vector_store %arg10[%c0_59, %c0_60, %c0_61], %102 {strides = array<i32>} : memref<1x1x1xf32, #tpu.memory_space<vmem>>, vector<1x1x1xf32>,
      %cst_62 = arith.constant 0.000000e+00 : f32
      %104 = vector.broadcast %cst_62 : f32 to vector<1x1x1xf32>
      %c0_63 = arith.constant 0 : index
      %c0_64 = arith.constant 0 : index
      %c0_65 = arith.constant 0 : index
      %105 = vector.load %arg11[%c0_63, %c0_64, %c0_65] : memref<1x1x1xf32, #tpu.memory_space<vmem>>, vector<1x1x1xf32>
      tpu.vector_store %arg11[%c0_63, %c0_64, %c0_65], %104 {strides = array<i32>} : memref<1x1x1xf32, #tpu.memory_space<vmem>>, vector<1x1x1xf32>,
      %cst_66 = arith.constant 0.000000e+00 : f32
      %106 = vector.broadcast %cst_66 : f32 to vector<1x1x1xf32>
      %c0_67 = arith.constant 0 : index
      %c0_68 = arith.constant 0 : index
      %c0_69 = arith.constant 0 : index
      %107 = vector.load %arg12[%c0_67, %c0_68, %c0_69] : memref<1x1x1xf32, #tpu.memory_space<vmem>>, vector<1x1x1xf32>
      tpu.vector_store %arg12[%c0_67, %c0_68, %c0_69], %106 {strides = array<i32>} : memref<1x1x1xf32, #tpu.memory_space<vmem>>, vector<1x1x1xf32>,
    } else {
    }
    %c0 = arith.constant 0 : index
    %c0_1 = arith.constant 0 : index
    %c0_2 = arith.constant 0 : index
    %3 = vector.load %arg2[%c0, %c0_1, %c0_2] : memref<1x3x256xf32, #tpu.memory_space<vmem>>, vector<1x3x256xf32>
    %4 = vector.shape_cast %3 : vector<1x3x256xf32> to vector<3x256xf32>
    %c0_3 = arith.constant 0 : index
    %c0_4 = arith.constant 0 : index
    %5 = vector.load %arg4[%c0_3, %c0_4] : memref<32x3xf32, #tpu.memory_space<vmem>>, vector<32x3xf32>
    %cst = arith.constant dense<0.000000e+00> : vector<32x256xf32>
    %6 = tpu.matmul %5, %4, %cst {dimension_numbers = #tpu.dot_dimension_numbers<[1], [0], [0], [1], [0, 0, 1, 1], [], []>} : vector<32x3xf32>, vector<3x256xf32>, vector<32x256xf32> -> vector<32x256xf32>
    %c0_5 = arith.constant 0 : index
    %c0_6 = arith.constant 0 : index
    %7 = vector.load %arg5[%c0_5, %c0_6] : memref<32x1xf32, #tpu.memory_space<vmem>>, vector<32x1xf32>
    %8 = vector.broadcast %7 : vector<32x1xf32> to vector<32x256xf32>
    %9 = arith.addf %6, %8 : vector<32x256xf32>
    %c0_7 = arith.constant 0 : index
    %c0_8 = arith.constant 0 : index
    %10 = vector.load %arg6[%c0_7, %c0_8] : memref<9x32xf32, #tpu.memory_space<vmem>>, vector<9x32xf32>
    %cst_9 = arith.constant dense<0.000000e+00> : vector<9x256xf32>
    %11 = tpu.matmul %10, %9, %cst_9 {dimension_numbers = #tpu.dot_dimension_numbers<[1], [0], [0], [1], [0, 0, 1, 1], [], []>} : vector<9x32xf32>, vector<32x256xf32>, vector<9x256xf32> -> vector<9x256xf32>
    %c0_10 = arith.constant 0 : index
    %c0_11 = arith.constant 0 : index
    %12 = vector.load %arg7[%c0_10, %c0_11] : memref<9x1xf32, #tpu.memory_space<vmem>>, vector<9x1xf32>
    %13 = vector.broadcast %12 : vector<9x1xf32> to vector<9x256xf32>
    %14 = arith.addf %11, %13 : vector<9x256xf32>
    %15 = tpu.iota {dimensions = array<i32: 0>} : vector<9x256xi32>
    %c4_i32 = arith.constant 4 : i32
    %16 = vector.broadcast %c4_i32 : i32 to vector<9x256xi32>
    %17 = arith.cmpi slt, %15, %16 : vector<9x256xi32>
    %cst_12 = arith.constant -1.000000e+30 : f32
    %18 = vector.broadcast %cst_12 : f32 to vector<9x256xf32>
    %19 = arith.select %17, %14, %18 : vector<9x256xi1>, vector<9x256xf32>
    %cst_13 = arith.constant dense<0xFF800000> : vector<256xf32>
    %20 = vector.multi_reduction <maximumf>, %19, %cst_13 [0] : vector<9x256xf32> to vector<256xf32>
    %21 = vector.shape_cast %20 : vector<256xf32> to vector<1x256xf32>
    %22 = vector.broadcast %21 : vector<1x256xf32> to vector<9x256xf32>
    %23 = arith.cmpf oeq, %19, %22 : vector<9x256xf32>
    %c9_i32 = arith.constant 9 : i32
    %24 = vector.broadcast %c9_i32 : i32 to vector<9x256xi32>
    %25 = arith.select %23, %15, %24 : vector<9x256xi1>, vector<9x256xi32>
    %cst_14 = arith.constant dense<2147483647> : vector<256xi32>
    %26 = vector.multi_reduction <minsi>, %25, %cst_14 [0] : vector<9x256xi32> to vector<256xi32>
    %27 = vector.shape_cast %26 : vector<256xi32> to vector<1x256xi32>
    %c0_15 = arith.constant 0 : index
    %c0_16 = arith.constant 0 : index
    %c0_17 = arith.constant 0 : index
    %28 = vector.load %arg8[%c0_15, %c0_16, %c0_17] : memref<1x1x256xi32, #tpu.memory_space<vmem>>, vector<1x1x256xi32>
    %29 = vector.shape_cast %28 : vector<1x1x256xi32> to vector<1x256xi32>
    %30 = vector.shape_cast %27 : vector<1x256xi32> to vector<1x1x256xi32>
    tpu.vector_store %arg8[%c0_15, %c0_16, %c0_17], %30 {strides = array<i32>} : memref<1x1x256xi32, #tpu.memory_space<vmem>>, vector<1x1x256xi32>,
    %c0_18 = arith.constant 0 : index
    %c0_19 = arith.constant 0 : index
    %c0_20 = arith.constant 0 : index
    %31 = vector.load %arg3[%c0_18, %c0_19, %c0_20] : memref<1x1x256xi32, #tpu.memory_space<vmem>>, vector<1x1x256xi32>
    %32 = vector.shape_cast %31 : vector<1x1x256xi32> to vector<1x256xi32>
    %33 = vector.broadcast %21 : vector<1x256xf32> to vector<9x256xf32>
    %34 = arith.subf %19, %33 : vector<9x256xf32>
    %35 = math.exp %34 : vector<9x256xf32>
    %cst_21 = arith.constant dense<0.000000e+00> : vector<256xf32>
    %36 = vector.multi_reduction <add>, %35, %cst_21 [0] : vector<9x256xf32> to vector<256xf32>
    %37 = vector.shape_cast %36 : vector<256xf32> to vector<1x256xf32>
    %38 = math.log %37 : vector<1x256xf32>
    %39 = arith.addf %21, %38 : vector<1x256xf32>
    %40 = vector.broadcast %32 : vector<1x256xi32> to vector<9x256xi32>
    %41 = arith.cmpi eq, %15, %40 : vector<9x256xi32>
    %cst_22 = arith.constant 0.000000e+00 : f32
    %42 = vector.broadcast %cst_22 : f32 to vector<9x256xf32>
    %43 = arith.select %41, %14, %42 : vector<9x256xi1>, vector<9x256xf32>
    %cst_23 = arith.constant dense<0.000000e+00> : vector<256xf32>
    %44 = vector.multi_reduction <add>, %43, %cst_23 [0] : vector<9x256xf32> to vector<256xf32>
    %45 = vector.shape_cast %44 : vector<256xf32> to vector<1x256xf32>
    %c0_i32_24 = arith.constant 0 : i32
    %46 = vector.broadcast %c0_i32_24 : i32 to vector<1x256xi32>
    %47 = arith.cmpi sge, %32, %46 : vector<1x256xi32>
    %c4_i32_25 = arith.constant 4 : i32
    %48 = vector.broadcast %c4_i32_25 : i32 to vector<1x256xi32>
    %49 = arith.cmpi slt, %32, %48 : vector<1x256xi32>
    %50 = arith.andi %47, %49 : vector<1x256xi1>
    %51 = arith.extui %50 : vector<1x256xi1> to vector<1x256xi32>
    %52 = arith.sitofp %51 : vector<1x256xi32> to vector<1x256xf32>
    %53 = arith.subf %39, %45 : vector<1x256xf32>
    %54 = arith.mulf %53, %52 : vector<1x256xf32>
    %c0_26 = arith.constant 0 : index
    %c0_27 = arith.constant 0 : index
    %c0_28 = arith.constant 0 : index
    %55 = vector.load %arg10[%c0_26, %c0_27, %c0_28] : memref<1x1x1xf32, #tpu.memory_space<vmem>>, vector<1x1x1xf32>
    %56 = vector.shape_cast %54 : vector<1x256xf32> to vector<1x1x256xf32>
    %cst_29 = arith.constant dense<0.000000e+00> : vector<1xf32>
    %57 = vector.multi_reduction <add>, %56, %cst_29 [1, 2] : vector<1x1x256xf32> to vector<1xf32>
    %58 = vector.shape_cast %57 : vector<1xf32> to vector<1x1x1xf32>
    %59 = vector.extract %58[0, 0, 0] : f32 from vector<1x1x1xf32>
    %60 = vector.broadcast %59 : f32 to vector<1x1x1xf32>
    %61 = arith.addf %55, %60 : vector<1x1x1xf32>
    %c0_30 = arith.constant 0 : index
    %c0_31 = arith.constant 0 : index
    %c0_32 = arith.constant 0 : index
    %62 = vector.load %arg10[%c0_30, %c0_31, %c0_32] : memref<1x1x1xf32, #tpu.memory_space<vmem>>, vector<1x1x1xf32>
    tpu.vector_store %arg10[%c0_30, %c0_31, %c0_32], %61 {strides = array<i32>} : memref<1x1x1xf32, #tpu.memory_space<vmem>>, vector<1x1x1xf32>,
    %c0_33 = arith.constant 0 : index
    %c0_34 = arith.constant 0 : index
    %c0_35 = arith.constant 0 : index
    %63 = vector.load %arg11[%c0_33, %c0_34, %c0_35] : memref<1x1x1xf32, #tpu.memory_space<vmem>>, vector<1x1x1xf32>
    %64 = vector.shape_cast %52 : vector<1x256xf32> to vector<1x1x256xf32>
    %cst_36 = arith.constant dense<0.000000e+00> : vector<1xf32>
    %65 = vector.multi_reduction <add>, %64, %cst_36 [1, 2] : vector<1x1x256xf32> to vector<1xf32>
    %66 = vector.shape_cast %65 : vector<1xf32> to vector<1x1x1xf32>
    %67 = vector.extract %66[0, 0, 0] : f32 from vector<1x1x1xf32>
    %68 = vector.broadcast %67 : f32 to vector<1x1x1xf32>
    %69 = arith.addf %63, %68 : vector<1x1x1xf32>
    %c0_37 = arith.constant 0 : index
    %c0_38 = arith.constant 0 : index
    %c0_39 = arith.constant 0 : index
    %70 = vector.load %arg11[%c0_37, %c0_38, %c0_39] : memref<1x1x1xf32, #tpu.memory_space<vmem>>, vector<1x1x1xf32>
    tpu.vector_store %arg11[%c0_37, %c0_38, %c0_39], %69 {strides = array<i32>} : memref<1x1x1xf32, #tpu.memory_space<vmem>>, vector<1x1x1xf32>,
    %71 = arith.mulf %9, %9 : vector<32x256xf32>
    %cst_40 = arith.constant dense<0.000000e+00> : vector<256xf32>
    %72 = vector.multi_reduction <add>, %71, %cst_40 [0] : vector<32x256xf32> to vector<256xf32>
    %73 = vector.shape_cast %72 : vector<256xf32> to vector<1x256xf32>
    %cst_41 = arith.constant 9.99999996E-13 : f32
    %74 = vector.broadcast %cst_41 : f32 to vector<1x256xf32>
    %75 = arith.addf %73, %74 : vector<1x256xf32>
    %76 = math.rsqrt %75 : vector<1x256xf32>
    %cst_42 = arith.constant -1.000000e+30 : f32
    %77 = vector.broadcast %cst_42 : f32 to vector<9x256xf32>
    %78 = arith.select %17, %77, %14 : vector<9x256xi1>, vector<9x256xf32>
    %cst_43 = arith.constant dense<0xFF800000> : vector<256xf32>
    %79 = vector.multi_reduction <maximumf>, %78, %cst_43 [0] : vector<9x256xf32> to vector<256xf32>
    %80 = vector.shape_cast %79 : vector<256xf32> to vector<1x256xf32>
    %81 = vector.broadcast %80 : vector<1x256xf32> to vector<9x256xf32>
    %82 = arith.cmpf oeq, %78, %81 : vector<9x256xf32>
    %c4_i32_44 = arith.constant 4 : i32
    %83 = vector.broadcast %c4_i32_44 : i32 to vector<9x256xi32>
    %84 = arith.subi %15, %83 : vector<9x256xi32>
    %c9_i32_45 = arith.constant 9 : i32
    %85 = vector.broadcast %c9_i32_45 : i32 to vector<9x256xi32>
    %86 = arith.select %82, %84, %85 : vector<9x256xi1>, vector<9x256xi32>
    %cst_46 = arith.constant dense<2147483647> : vector<256xi32>
    %87 = vector.multi_reduction <minsi>, %86, %cst_46 [0] : vector<9x256xi32> to vector<256xi32>
    %88 = vector.shape_cast %87 : vector<256xi32> to vector<1x256xi32>
    %c0_47 = arith.constant 0 : index
    %c0_48 = arith.constant 0 : index
    %c0_49 = arith.constant 0 : index
    %89 = vector.load %arg9[%c0_47, %c0_48, %c0_49] : memref<1x1x256xi32, #tpu.memory_space<vmem>>, vector<1x1x256xi32>
    %90 = vector.shape_cast %89 : vector<1x1x256xi32> to vector<1x256xi32>
    %91 = vector.shape_cast %88 : vector<1x256xi32> to vector<1x1x256xi32>
    tpu.vector_store %arg9[%c0_47, %c0_48, %c0_49], %91 {strides = array<i32>} : memref<1x1x256xi32, #tpu.memory_space<vmem>>, vector<1x1x256xi32>,
    %c0_50 = arith.constant 0 : index
    %c0_51 = arith.constant 0 : index
    %c0_52 = arith.constant 0 : index
    %92 = vector.load %arg12[%c0_50, %c0_51, %c0_52] : memref<1x1x1xf32, #tpu.memory_space<vmem>>, vector<1x1x1xf32>
    %93 = arith.mulf %80, %76 : vector<1x256xf32>
    %94 = vector.shape_cast %93 : vector<1x256xf32> to vector<1x1x256xf32>
    %cst_53 = arith.constant dense<0.000000e+00> : vector<1xf32>
    %95 = vector.multi_reduction <add>, %94, %cst_53 [1, 2] : vector<1x1x256xf32> to vector<1xf32>
    %96 = vector.shape_cast %95 : vector<1xf32> to vector<1x1x1xf32>
    %97 = vector.extract %96[0, 0, 0] : f32 from vector<1x1x1xf32>
    %cst_54 = arith.constant 0.000000e+00 : f32
    %98 = arith.subf %cst_54, %97 : f32
    %99 = vector.broadcast %98 : f32 to vector<1x1x1xf32>
    %100 = arith.addf %92, %99 : vector<1x1x1xf32>
    %c0_55 = arith.constant 0 : index
    %c0_56 = arith.constant 0 : index
    %c0_57 = arith.constant 0 : index
    %101 = vector.load %arg12[%c0_55, %c0_56, %c0_57] : memref<1x1x1xf32, #tpu.memory_space<vmem>>, vector<1x1x1xf32>
    tpu.vector_store %arg12[%c0_55, %c0_56, %c0_57], %100 {strides = array<i32>} : memref<1x1x1xf32, #tpu.memory_space<vmem>>, vector<1x1x1xf32>,
    return
  }
  func.func @transform_0(%arg0: i32, %arg1: i32) -> (i32, i32, i32) {
    %c0_i32 = arith.constant 0 : i32
    %c0_i32_0 = arith.constant 0 : i32
    return %arg0, %c0_i32, %arg1 : i32, i32, i32
  }
  func.func @transform_1(%arg0: i32, %arg1: i32) -> (i32, i32, i32) {
    %c0_i32 = arith.constant 0 : i32
    %c0_i32_0 = arith.constant 0 : i32
    return %arg0, %c0_i32, %arg1 : i32, i32, i32
  }
  func.func @transform_2(%arg0: i32, %arg1: i32) -> (i32, i32) {
    %c0_i32 = arith.constant 0 : i32
    %c0_i32_0 = arith.constant 0 : i32
    %c0_i32_1 = arith.constant 0 : i32
    return %c0_i32, %c0_i32_0 : i32, i32
  }
  func.func @transform_3(%arg0: i32, %arg1: i32) -> (i32, i32) {
    %c0_i32 = arith.constant 0 : i32
    %c0_i32_0 = arith.constant 0 : i32
    %c0_i32_1 = arith.constant 0 : i32
    return %c0_i32, %c0_i32_0 : i32, i32
  }
  func.func @transform_4(%arg0: i32, %arg1: i32) -> (i32, i32) {
    %c0_i32 = arith.constant 0 : i32
    %c0_i32_0 = arith.constant 0 : i32
    %c0_i32_1 = arith.constant 0 : i32
    return %c0_i32, %c0_i32_0 : i32, i32
  }
  func.func @transform_5(%arg0: i32, %arg1: i32) -> (i32, i32) {
    %c0_i32 = arith.constant 0 : i32
    %c0_i32_0 = arith.constant 0 : i32
    %c0_i32_1 = arith.constant 0 : i32
    return %c0_i32, %c0_i32_0 : i32, i32
  }
  func.func @transform_6(%arg0: i32, %arg1: i32) -> (i32, i32, i32) {
    %c0_i32 = arith.constant 0 : i32
    %c0_i32_0 = arith.constant 0 : i32
    return %arg0, %c0_i32, %arg1 : i32, i32, i32
  }
  func.func @transform_7(%arg0: i32, %arg1: i32) -> (i32, i32, i32) {
    %c0_i32 = arith.constant 0 : i32
    %c0_i32_0 = arith.constant 0 : i32
    return %arg0, %c0_i32, %arg1 : i32, i32, i32
  }
  func.func @transform_8(%arg0: i32, %arg1: i32) -> (i32, i32, i32) {
    %c0_i32 = arith.constant 0 : i32
    %c0_i32_0 = arith.constant 0 : i32
    %c0_i32_1 = arith.constant 0 : i32
    return %arg0, %c0_i32, %c0_i32_0 : i32, i32, i32
  }
  func.func @transform_9(%arg0: i32, %arg1: i32) -> (i32, i32, i32) {
    %c0_i32 = arith.constant 0 : i32
    %c0_i32_0 = arith.constant 0 : i32
    %c0_i32_1 = arith.constant 0 : i32
    return %arg0, %c0_i32, %c0_i32_0 : i32, i32, i32
  }
  func.func @transform_10(%arg0: i32, %arg1: i32) -> (i32, i32, i32) {
    %c0_i32 = arith.constant 0 : i32
    %c0_i32_0 = arith.constant 0 : i32
    %c0_i32_1 = arith.constant 0 : i32
    return %arg0, %c0_i32, %c0_i32_0 : i32, i32, i32
  }
}

</mosaic_0001>

<bundles_post_ra>
// kernel: cluster_wrapper_forward.1
= control target key start
LH: loop header
LB: loop body
LE: loop exit
PB: predicated region body
PF: predicated region fallthrough
CT: control target
= control target key end

     0   :  { %s1338_s13 = smov 0   ;;  %s1340_s14 = smov 0   ;;  %s1679_s0 = inlined_call_operand.vmem [shape: f32[2,3,256], index: 0, kind: input, shape index: {}]   ;;  %s1680_s1 = inlined_call_operand.vmem [shape: s32[2,1,256], index: 1, kind: input, shape index: {}]   ;;  %s1681_s2 = inlined_call_operand.vmem [shape: f32[32,3], index: 2, kind: input, shape index: {}]   ;;  %s1682_s3 = inlined_call_operand.vmem [shape: f32[32,1], index: 3, kind: input, shape index: {}]   ;;  %s1683_s4 = inlined_call_operand.vmem [shape: f32[9,32], index: 4, kind: input, shape index: {}]   ;;  %s1684_s5 = inlined_call_operand.vmem [shape: f32[9,1], index: 5, kind: input, shape index: {}]   ;;  %s1685_s6 = inlined_call_operand.vmem [shape: s32[2,1,256], index: 6, kind: output, shape index: {0}]   ;;  %s1686_s7 = inlined_call_operand.vmem [shape: s32[2,1,256], index: 7, kind: output, shape index: {1}]   ;;  %s1687_s8 = inlined_call_operand.vmem [shape: f32[2,1,1], index: 8, kind: output, shape index: {2}]   ;;  %s1688_s9 = inlined_call_operand.vmem [shape: f32[2,1,1], index: 9, kind: output, shape index: {3}]   ;;  %s1689_s10 = inlined_call_operand.vmem [shape: f32[2,1,1], index: 10, kind: output, shape index: {4}]  }
   0x1   :  { %s1342_s15 = smov 0  }
   0x2 LB: > { %s33_s16 = sadd.s32 1, %s1274_s14  ;;  %p1176_p0 = scmp.ge.s32.totalorder %s1278_s15, 1  ;;  %s1278_s15 = sphi %s1342_s15, %s21_s15   ;;  %s1274_s14 = sphi %s1340_s14, %s1705_s14   ;;  %s1270_s13 = sphi %s1338_s13, %s1704_s13  }
   0x3   : > { %p35_p1 = scmp.ge.s32.totalorder %s33_s16, 2  ;;  %p360_p2 = scmp.lt.s32.totalorder %s1278_s15, 3 }
   0x5   : > { %s1707_s16 = smov (%p35_p1, %s33_s16), 0  ;;  %p361_p3 = pnand %p1176_p0, %p360_p2 }
   0x6   : > { %p431_p4 = scmp.lt.s32.totalorder (!%p361_p3), %s1270_s13, 1 }
   0x7   : > { %364 = sbr.rel (%p361_p3) target bundleno = 568 (0x238), region = 44 }
   0xc   : > { %v490_v0 = vld [vmem:[%s1682_s3 + $0x8] sm:$0xff]  ;;  %v1280_v1 = vmov 0   ;;  %s1709_s13 = smov (!%p431_p4, %s1270_s13), 1  ;;  %v492_v2 = vld [vmem:[%s1682_s3 + $0x18] sm:$0xff]  ;;  %v489_v4 = vld [vmem:[%s1682_s3] sm:$0xff]  ;;  %vm530_vm0 = vcmask 1042432  }
   0xd   : > { %1238 = vset.pattern.permute.xlu1 %v1280_v1  ;;  %1237 = vset.pattern.permute.xlu0 %v1280_v1  ;;  %s1203_s21 = sshll.u32 %s1709_s13, 3  ;;  %v491_v5 = vld [vmem:[%s1682_s3 + $0x10] sm:$0xff]  ;;  %v485_v6 = vld [vmem:[%s1681_s2] sm:$0xff]  ;;  %vm517_vm1 = vcmask 23552   ;;  %v486_v9 = vld [vmem:[%s1681_s2 + $0x8] sm:$0xff]  ;;  %vm607_vm2 = vcmask 261120   ;;  %s1638_s25 = scalar_lea.vmem %s1687_s8, %s1709_s13 }
   0xe   : > { %500 = vperm.xlu1 %1238, %v490_v0   ;;  %1239 = vset.pattern.permute.xlu2 %v1280_v1  ;;  %s438_s24 = scalar_lea.vmem %s1679_s0, %s1203_s21  ;;  %v487_v10 = vld [vmem:[%s1681_s2 + $0x10] sm:$0xff]  ;;  %v488_v11 = vld [vmem:[%s1681_s2 + $0x18] sm:$0xff]  ;;  %v595_v30 = vld [vmem:[%s1684_s5] sm:$0xff]  ;;  %vm669_vm3 = vcmask 1040384   ;;  %s1414_s29 = sshll.u32 %s1709_s13, 1 }
   0xf   : > { %510 = vperm.xlu0 %1237, %v492_v2   ;;  %v484_v3 = vld [vmem:[%s438_s24] sm:$0x77]  ;;  %599 = vperm.xlu2 %1239, %v595_v30   ;;  %v596_v37 = vld [vmem:[%s1684_s5 + $0x8] sm:$0x1]  ;;  %s447_s12 = scalar_lea.vmem %s1680_s1, %s1414_s29  ;;  %s456_s19 = scalar_lea.vmem %s1685_s6, %s1414_s29 }
  0x10   : > { %514 = vst [vmem:[#allocation1] ss:$2 sm:$0xff] %v484_v3  ;;  %v593_v48 = vld [vmem:[%s1683_s4] sm:$0xff]  ;;  %v594_v49 = vld [vmem:[%s1683_s4 + $0x8] sm:$0x1]  ;;  %v660_v3 = vlaneseq  ;;  %s465_s22 = scalar_lea.vmem %s1686_s7, %s1414_s29  ;;  %s1644_s28 = scalar_lea.vmem %s1688_s9, %s1709_s13 }
  0x11   : > { %s1650_s11 = scalar_lea.vmem %s1689_s10, %s1709_s13 }
  0x16   : > { %495 = vperm.xlu1 %1238, %v489_v4  }
  0x17   : > { %505 = vperm.xlu0 %1237, %v491_v5   ;;  %v515_v7 = vld.sshfl [vmem:[#allocation1] sm:$0xff pattern:$0x75316420]  ;;  %v516_v8 = vld.sshfl [vmem:[#allocation1 + $0x8] sm:$0xff pattern:$0x75316420]  ;;  %604 = vperm.xlu2 %1239, %v596_v37  }
  0x18   : > { %1182 = vmatpush.msk.msra.mxu0 %vm530_vm0, %v515_v7  ;;  %1187 = vmatpush.msk.msra.mxu1 %vm530_vm0, %v516_v8 }
  0x19   : > { %1183 = vmatmul.msk.f32.vlgmr.msra.gmra.mxu0 %vm517_vm1, %v485_v6  ;;  %1188 = vmatmul.msk.f32.vlgmr.msra.gmra.mxu1 %vm517_vm1, %v485_v6  ;;  %v1410_v6 = vshrl.u32 %v660_v3, 7 }
  0x1b   : > { %vm663_vm4 = vcmp.lt.s32.totalorder %v1410_v6, 4 }
  0x21   : > { %1184 = vmatmul.msk.f32.gmra.mxu0 %vm517_vm1, %v486_v9  ;;  %1189 = vmatmul.msk.f32.gmra.mxu1 %vm517_vm1, %v486_v9 }
  0x29   : > { %1185 = vmatmul.msk.f32.gmra.mxu0 %vm517_vm1, %v487_v10  ;;  %1190 = vmatmul.msk.f32.gmra.mxu1 %vm517_vm1, %v487_v10 }
  0x31   : > { %1186 = vmatmul.msk.f32.gmra.mxu0 %vm517_vm1, %v488_v11  ;;  %1191 = vmatmul.msk.f32.gmra.mxu1 %vm517_vm1, %v488_v11 }
  0x69   : > { %v600_v7 = vpop.permute.xlu2 %599 }
  0x80   : > { %v501_v12 = vpop.permute.xlu1 %500 }
  0x81   : > { %v511_v16 = vpop.permute.xlu0 %510 }
  0x88   : > { %v496_v15 = vpop.permute.xlu1 %495 }
  0x89   : > { %v506_v29 = vpop.permute.xlu0 %505 }
  0x96   : > { %v552_v13 = vpop.f32.mrf.mxu0  ;;  %v581_v14 = vpop.f32.mrf.mxu1 }
  0x97   : > { %v553_v17 = vadd.f32 %v552_v13, %v496_v15  ;;  %v582_v18 = vadd.f32 %v581_v14, %v496_v15  ;;  %v1281_v13 = vmov -inf  }
  0x98   : > { %v670_v14 = vsel %vm669_vm3, -1e+30, %v1281_v13 }
  0x99   : > { %v833_v23 = vmul.f32 %v553_v17, %v553_v17  ;;  %v834_v24 = vmul.f32 %v582_v18, %v582_v18 }
  0x9e   : > { %v555_v19 = vpop.f32.mrf.mxu0  ;;  %v584_v20 = vpop.f32.mrf.mxu1 }
  0x9f   : > { %v556_v21 = vadd.f32 %v555_v19, %v501_v12  ;;  %v585_v22 = vadd.f32 %v584_v20, %v501_v12 }
  0xa1   : > { %v835_v25 = vmul.f32 %v556_v21, %v556_v21  ;;  %v836_v26 = vmul.f32 %v585_v22, %v585_v22 }
  0xa3   : > { %v841_v27 = vadd.f32 %v835_v25, %v833_v23  ;;  %v850_v28 = vadd.f32 %v836_v26, %v834_v24  ;;  %v1442_v23 = vadd.s32 8, %v1410_v6 }
  0xa6   : > { %v558_v31 = vpop.f32.mrf.mxu0  ;;  %v587_v32 = vpop.f32.mrf.mxu1 }
  0xa7   : > { %v559_v33 = vadd.f32 %v558_v31, %v506_v29  ;;  %v588_v34 = vadd.f32 %v587_v32, %v506_v29 }
  0xa9   : > { %v837_v35 = vmul.f32 %v559_v33, %v559_v33  ;;  %v838_v36 = vmul.f32 %v588_v34, %v588_v34 }
  0xab   : > { %v842_v38 = vadd.f32 %v841_v27, %v837_v35  ;;  %v851_v39 = vadd.f32 %v850_v28, %v838_v36  ;;  %v605_v27 = vpop.permute.xlu2 %604 }
  0xae   : > { %v561_v40 = vpop.f32.mrf.mxu0  ;;  %v590_v41 = vpop.f32.mrf.mxu1 }
  0xaf   : > { %v562_v42 = vadd.f32 %v561_v40, %v511_v16  ;;  %v591_v43 = vadd.f32 %v590_v41, %v511_v16 }
  0xb1   : > { %v839_v44 = vmul.f32 %v562_v42, %v562_v42  ;;  %v840_v45 = vmul.f32 %v591_v43, %v591_v43  ;;  %626 = vmatpush.msra.mxu2 %v562_v42  ;;  %649 = vmatpush.msra.mxu3 %v591_v43 }
  0xb3   : > { %v843_v46 = vadd.f32 %v842_v38, %v839_v44  ;;  %v852_v47 = vadd.f32 %v851_v39, %v840_v45  ;;  %627 = vmatpush.msra.mxu2 %v559_v33  ;;  %650 = vmatpush.msra.mxu3 %v588_v34 }
  0xb5   : > { %628 = vmatpush.msra.mxu2 %v556_v21  ;;  %651 = vmatpush.msra.mxu3 %v585_v22  ;;  %v844_v50 = vrot.slane %v843_v46, 4  ;;  %v853_v52 = vrot.slane %v852_v47, 4  ;;  %v1437_v21 = vld [vmem:[%s447_s12] sm:$0x3] }
  0xb6   : > { %v760_v30 = vperm.slane %v1437_v21, 0  ;;  %v761_v31 = vperm.slane %v1437_v21, 1 }
  0xb7   : > { %629 = vmatpush.msra.mxu2 %v553_v17  ;;  %652 = vmatpush.msra.mxu3 %v582_v18  ;;  %v845_v51 = vadd.f32 %v844_v50, %v843_v46  ;;  %v854_v54 = vadd.f32 %v853_v52, %v852_v47 }
  0xb8   : > { %1192 = vmatmul.msk.f32.vlgmr.msra.gmra.mxu2 %vm607_vm2, %v593_v48  ;;  %1194 = vmatmul.msk.f32.vlgmr.msra.gmra.mxu3 %vm607_vm2, %v593_v48  ;;  %vm1462_vm10 = vcmp.eq.s32.totalorder %v1442_v23, %v760_v30  ;;  %vm1481_vm11 = vcmp.eq.s32.totalorder %v1442_v23, %v761_v31  ;;  %vm1486_vm12 = vcmp.eq.s32.totalorder %v1410_v6, %v760_v30 }
  0xb9   : > { %v846_v53 = vrot.slane %v845_v51, 2  ;;  %v855_v56 = vrot.slane %v854_v54, 2  ;;  %vm1491_vm13 = vcmp.eq.s32.totalorder %v1410_v6, %v761_v31 }
  0xbb   : > { %v847_v55 = vadd.f32 %v846_v53, %v845_v51  ;;  %v856_v58 = vadd.f32 %v855_v56, %v854_v54 }
  0xbd   : > { %v848_v57 = vrot.slane %v847_v55, 1  ;;  %v857_v60 = vrot.slane %v856_v58, 1 }
  0xbf   : > { %v849_v59 = vadd.f32 %v848_v57, %v847_v55  ;;  %v858_v62 = vadd.f32 %v857_v60, %v856_v58  ;;  %v1519_v60 = vadd.s32 4294967292, %v1410_v6 }
  0xc0   : > { %1193 = vmatmul.msk.f32.gmra.mxu2 %vm607_vm2, %v594_v49  ;;  %1195 = vmatmul.msk.f32.gmra.mxu3 %vm607_vm2, %v594_v49 }
  0xc1   : > { %v859_v61 = vadd.f32 1e-12, %v849_v59  ;;  %v1398_v63 = vadd.f32 1e-12, %v858_v62 }
  0xc3   : > { %1240 = vrsqrt.f32 %v859_v61  ;;  %vm867_vm6 = vweird.f32 %v859_v61  ;;  %vm877_vm7 = vweird.f32 %v1398_v63 }
  0xc4   : > { %1242 = vrsqrt.f32 %v1398_v63 }
  0xc9   : > { %v1401_v0 = vpop.eup %1240 }
  0xca   : > { %v862_v1 = vmul.f32 %v1401_v0, %v859_v61  ;;  %v1404_v2 = vpop.eup %1242  ;;  %vm868_vm5 = vweird.f32 %v1401_v0  ;;  %v1522_v61 = vadd.s32 4294967292, %v1442_v23 }
  0xcb   : > { %v872_v5 = vmul.f32 %v1404_v2, %v1398_v63  ;;  %vm1456_vm8 = vmor %vm867_vm6, %vm868_vm5  ;;  %vm878_vm9 = vweird.f32 %v1404_v2 }
  0xcc   : > { %v863_v4 = vmul.f32 %v1401_v0, %v862_v1  ;;  %vm1514_vm14 = vmor %vm877_vm7, %vm878_vm9  ;;  %vm786_vm9 = vcmp.ge.s32.totalorder %v1437_v21, 0 }
  0xcd   : > { %v873_v9 = vmul.f32 %v1404_v2, %v872_v5 }
  0xce   : > { %v864_v8 = vmul.f32 0.5, %v863_v4 }
  0xcf   : > { %v874_v17 = vmul.f32 0.5, %v873_v9 }
  0xd0   : > { %v865_v16 = vsub.f32 1.5, %v864_v8 }
  0xd1   : > { %v875_v26 = vsub.f32 1.5, %v874_v17 }
  0xd2   : > { %v1445_v25 = vmul.f32 %v1401_v0, %v865_v16 }
  0xd3   : > { %v1471_v41 = vmul.f32 %v1404_v2, %v875_v26 }
  0xd4   : > { %v870_v40 = vsel %vm1456_vm8, %v1401_v0, %v1445_v25 }
  0xd5   : > { %v880_v62 = vsel %vm1514_vm14, %v1404_v2, %v1471_v41 }
 0x13b   : > { %v631_v10 = vpop.f32.mrf.mxu2  ;;  %v654_v11 = vpop.f32.mrf.mxu3 }
 0x13c   : > { %v1417_v12 = vadd.f32 %v631_v10, %v600_v7  ;;  %v1420_v15 = vadd.f32 %v654_v11, %v600_v7 }
 0x13e   : > { %v1429_v18 = vsel %vm663_vm4, %v1417_v12, -1e+30  ;;  %v1435_v20 = vsel %vm663_vm4, %v1420_v15, -1e+30  ;;  %v1476_v42 = vsel %vm663_vm4, -1e+30, %v1417_v12 }
 0x13f   : > { %v671_v19 = vmax.f32 %v1429_v18, %v670_v14  ;;  %v679_v22 = vmax.f32 %v1435_v20, %v670_v14  ;;  %v1499_v51 = vsel %vm663_vm4, -1e+30, %v1420_v15  ;;  %v766_v63 = vsel %vm1486_vm12, %v1417_v12, 0.0 }
 0x140   : > { %v767_v4 = vsel %vm1491_vm13, %v1420_v15, 0.0  ;;  %vm1566_vm13 = vcmp.lt.s32.totalorder %v660_v3, 256 }
 0x141   : > { %v672_v24 = vrot.slane %v671_v19, 4  ;;  %v680_v28 = vrot.slane %v679_v22, 4 }
 0x143   : > { %v673_v29 = vmax.f32 %v671_v19, %v672_v24  ;;  %v634_v32 = vpop.f32.mrf.mxu2  ;;  %v657_v33 = vpop.f32.mrf.mxu3  ;;  %v681_v34 = vmax.f32 %v679_v22, %v680_v28 }
 0x144   : > { %v1450_v35 = vadd.f32 %v634_v32, %v605_v27  ;;  %v1452_v36 = vadd.f32 %v657_v33, %v605_v27 }
 0x145   : > { %v674_v38 = vrot.slane %v673_v29, 2  ;;  %v682_v43 = vrot.slane %v681_v34, 2 }
 0x146   : > { %v885_v44 = vsel %vm669_vm3, %v1450_v35, -inf  ;;  %v768_v52 = vsel %vm1462_vm10, %v1450_v35, 0.0  ;;  %v893_v53 = vsel %vm669_vm3, %v1452_v36, -inf  ;;  %v769_v56 = vsel %vm1481_vm11, %v1452_v36, 0.0 }
 0x147   : > { %v675_v46 = vmax.f32 %v673_v29, %v674_v38  ;;  %v886_v49 = vmax.f32 %v1476_v42, %v885_v44  ;;  %v683_v50 = vmax.f32 %v681_v34, %v682_v43  ;;  %v894_v57 = vmax.f32 %v1499_v51, %v893_v53 }
 0x148   : > { %v770_v5 = vsel %vm669_vm3, %v768_v52, 0.0  ;;  %v778_v9 = vsel %vm669_vm3, %v769_v56, 0.0  ;;  %vm787_vm10 = vcmp.lt.s32.totalorder %v1437_v21, 4  ;;  %v1282_v53 = vmov 0.0  }
 0x149   : > { %v676_v54 = vrot.slane %v675_v46, 1  ;;  %v887_v55 = vrot.slane %v886_v49, 4  ;;  %v684_v59 = vrot.slane %v683_v50, 1  ;;  %v895_v10 = vrot.slane %v894_v57, 4  ;;  %vm788_vm11 = vmand %vm786_vm9, %vm787_vm10 }
 0x14a   : > { %v1558_v32 = vadd.f32 %v770_v5, %v766_v63  ;;  %v1572_v21 = vsel %vm788_vm11, 1.0, %v1282_v53 }
 0x14b   : > { %v1528_v1 = vmax.f32 %v675_v46, %v676_v54  ;;  %v1537_v7 = vmax.f32 %v683_v50, %v684_v59  ;;  %v888_v8 = vmax.f32 %v886_v49, %v887_v55  ;;  %v896_v38 = vmax.f32 %v894_v57, %v895_v10 }
 0x14c   : > { %v772_v45 = vrot.slane %v1558_v32, 4  ;;  %v794_v3 = vperm.slane %v1572_v21, 0 }
 0x14d   : > { %vm686_vm15 = vcmp.eq.f32.partialorder %v1429_v18, %v1528_v1  ;;  %vm1196_vm0 = vcmp.eq.f32.partialorder %v1528_v1, -1e+30  ;;  %v726_v11 = vsub.f32 %v1429_v18, %v1528_v1  ;;  %v728_v12 = vsub.f32 -1e+30, %v1528_v1 }
 0x14e   : > { %v690_v13 = vsel %vm686_vm15, %v1410_v6, 9  ;;  %v692_v14 = vsel %vm1196_vm0, %v1442_v23, 9  ;;  %vm687_vm1 = vcmp.eq.f32.partialorder %v1435_v20, %v1537_v7  ;;  %vm1197_vm2 = vcmp.eq.f32.partialorder %v1537_v7, -1e+30 }
 0x14f   : > { %v694_v15 = vsel %vm669_vm3, %v692_v14, 2147483647  ;;  %v730_v16 = vmul.f32 1.442695, %v726_v11  ;;  %v734_v17 = vmul.f32 1.442695, %v728_v12  ;;  %v727_v19 = vsub.f32 %v1435_v20, %v1537_v7 }
 0x150   : > { %vm695_vm4 = vcmp.lt.s32.totalorder %v690_v13, %v694_v15  ;;  %v691_v18 = vsel %vm687_vm1, %v1410_v6, 9  ;;  %v693_v22 = vsel %vm1197_vm2, %v1442_v23, 9  ;;  %v729_v24 = vsub.f32 -1e+30, %v1537_v7 }
 0x151   : > { %v696_v26 = vsel %vm695_vm4, %v690_v13, %v694_v15  ;;  %1244 = vpow2.f32 %v730_v16  ;;  %v706_v27 = vsel %vm669_vm3, %v693_v22, 2147483647  ;;  %v732_v28 = vmul.f32 1.442695, %v727_v19 }
 0x152   : > { %v697_v29 = vrot.slane %v696_v26, 4  ;;  %1246 = vpow2.f32 %v734_v17  ;;  %vm707_vm5 = vcmp.lt.s32.totalorder %v691_v18, %v706_v27  ;;  %v736_v30 = vmul.f32 1.442695, %v729_v24 }
 0x153   : > { %v708_v31 = vsel %vm707_vm5, %v691_v18, %v706_v27  ;;  %1248 = vpow2.f32 %v732_v28  ;;  %v889_v20 = vrot.slane %v888_v8, 2  ;;  %v1560_v23 = vadd.f32 %v778_v9, %v767_v4 }
 0x154   : > { %vm698_vm6 = vcmp.lt.s32.totalorder %v696_v26, %v697_v29  ;;  %v709_v6 = vrot.slane %v708_v31, 4  ;;  %1250 = vpow2.f32 %v736_v30  ;;  %v897_v47 = vrot.slane %v896_v38, 2 }
 0x155   : > { %v699_v33 = vsel %vm698_vm6, %v696_v26, %v697_v29  ;;  %v890_v34 = vmax.f32 %v888_v8, %v889_v20  ;;  %v780_v52 = vrot.slane %v1560_v23, 4  ;;  %v795_v22 = vperm.slane %v1572_v21, 1 }
 0x156   : > { %v700_v39 = vrot.slane %v699_v33, 2  ;;  %vm710_vm7 = vcmp.lt.s32.totalorder %v708_v31, %v709_v6  ;;  %v898_v59 = vmax.f32 %v896_v38, %v897_v47  ;;  %v818_v37 = vsel %vm669_vm3, %v794_v3, 0.0 }
 0x157   : > { %v1245_v43 = vpop.eup %1244  ;;  %v711_v44 = vsel %vm710_vm7, %v708_v31, %v709_v6  ;;  %v891_v46 = vrot.slane %v890_v34, 1  ;;  %v819_v30 = vsel %vm669_vm3, %v795_v22, 0.0  ;;  %v781_v38 = vadd.f32 %v780_v52, %v1560_v23 }
 0x158   : > { %v1247_v48 = vpop.eup %1246  ;;  %vm701_vm12 = vcmp.lt.s32.totalorder %v699_v33, %v700_v39  ;;  %v712_v49 = vrot.slane %v711_v44, 2  ;;  %v899_v16 = vrot.slane %v898_v59, 1  ;;  %v820_v2 = vadd.f32 %v819_v30, %v818_v37 }
 0x159   : > { %v1249_v54 = vpop.eup %1248  ;;  %v702_v55 = vsel %vm701_vm12, %v699_v33, %v700_v39  ;;  %v738_v56 = vsel %vm669_vm3, %v1247_v48, 0.0  ;;  %v892_v57 = vmax.f32 %v890_v34, %v891_v46  ;;  %v773_v33 = vadd.f32 %v772_v45, %v1558_v32 }
 0x15a   : > { %v1251_v63 = vpop.eup %1250  ;;  %v703_v4 = vrot.slane %v702_v55, 1  ;;  %v739_v5 = vadd.f32 %v1245_v43, %v738_v56  ;;  %vm713_vm15 = vcmp.lt.s32.totalorder %v711_v44, %v712_v49  ;;  %v900_v18 = vmax.f32 %v898_v59, %v899_v16  ;;  %821 = vadd.xlane.f32.xlu1 %v820_v2 }
 0x15b   : > { %v714_v8 = vsel %vm713_vm15, %v711_v44, %v712_v49  ;;  %v746_v9 = vsel %vm669_vm3, %v1251_v63, 0.0  ;;  %vm901_vm0 = vcmp.eq.f32.partialorder %v1476_v42, %v892_v57  ;;  %vm903_vm1 = vcmp.eq.f32.partialorder %v1450_v35, %v892_v57 }
 0x15c   : > { %vm704_vm2 = vcmp.lt.s32.totalorder %v702_v55, %v703_v4  ;;  %v740_v10 = vrot.slane %v739_v5, 4  ;;  %v715_v11 = vrot.slane %v714_v8, 1  ;;  %v747_v12 = vadd.f32 %v1249_v54, %v746_v9 }
 0x15d   : > { %v705_v13 = vsel %vm704_vm2, %v702_v55, %v703_v4  ;;  %v907_v14 = vsel %vm901_vm0, %v1519_v60, 9  ;;  %v909_v15 = vsel %vm903_vm1, %v1522_v61, 9  ;;  %v939_v35 = vmul.f32 %v892_v57, %v870_v40 }
 0x15e   : > { %vm716_vm4 = vcmp.lt.s32.totalorder %v714_v8, %v715_v11  ;;  %v748_v17 = vrot.slane %v747_v12, 4  ;;  %v911_v19 = vsel %vm669_vm3, %v909_v15, 2147483647  ;;  %vm902_vm8 = vcmp.eq.f32.partialorder %v1499_v51, %v900_v18 }
 0x15f   : > { %v717_v42 = vsel %vm716_vm4, %v714_v8, %v715_v11  ;;  %vm912_vm5 = vcmp.lt.s32.totalorder %v907_v14, %v911_v19  ;;  %v941_v27 = vsel %vm669_vm3, %v939_v35, 0.0  ;;  %vm904_vm6 = vcmp.eq.f32.partialorder %v1452_v36, %v900_v18 }
 0x160   : > { %v718_v24 = vrot.slane %v717_v42, 7  ;;  %v913_v26 = vsel %vm912_vm5, %v907_v14, %v911_v19  ;;  %v940_v0 = vmul.f32 %v900_v18, %v880_v62  ;;  %v908_v40 = vsel %vm902_vm8, %v1519_v60, 9 }
 0x161   : > { %v914_v28 = vrot.slane %v913_v26, 4  ;;  %v910_v29 = vsel %vm904_vm6, %v1522_v61, 9  ;;  %v741_v62 = vadd.f32 %v740_v10, %v739_v5  ;;  %v749_v61 = vadd.f32 %v748_v17, %v747_v12 }
 0x162   : > { %v719_v25 = vsel %vm669_vm3, %v705_v13, %v718_v24  ;;  %v923_v36 = vsel %vm669_vm3, %v910_v29, 2147483647  ;;  %v942_v51 = vsel %vm669_vm3, %v940_v0, 0.0  ;;  %v774_v49 = vrot.slane %v773_v33, 2 }
 0x163   : > { %724 = vst.msk [vmem:[%s456_s19] sm:$0x3] %vm1566_vm13, %v719_v25  ;;  %vm915_vm7 = vcmp.lt.s32.totalorder %v913_v26, %v914_v28  ;;  %vm924_vm14 = vcmp.lt.s32.totalorder %v908_v40, %v923_v36  ;;  %v943_v58 = vadd.f32 %v942_v51, %v941_v27  ;;  %v742_v6 = vrot.slane %v741_v62, 2 }
 0x164   : > { %v916_v41 = vsel %vm915_vm7, %v913_v26, %v914_v28  ;;  %v925_v31 = vsel %vm924_vm14, %v908_v40, %v923_v36  ;;  %v750_v34 = vrot.slane %v749_v61, 2  ;;  %v782_v56 = vrot.slane %v781_v38, 2 }
 0x165   : > { %v917_v60 = vrot.slane %v916_v41, 2  ;;  %v926_v20 = vrot.slane %v925_v31, 4  ;;  %944 = vadd.xlane.f32.xlu2 %v943_v58  ;;  %v743_v39 = vadd.f32 %v742_v6, %v741_v62  ;;  %v775_v23 = vadd.f32 %v774_v49, %v773_v33 }
 0x166   : > { %v751_v46 = vadd.f32 %v750_v34, %v749_v61  ;;  %v783_v52 = vadd.f32 %v782_v56, %v781_v38 }
 0x167   : > { %vm918_vm9 = vcmp.lt.s32.totalorder %v916_v41, %v917_v60  ;;  %vm927_vm10 = vcmp.lt.s32.totalorder %v925_v31, %v926_v20  ;;  %v744_v48 = vrot.slane %v743_v39, 1  ;;  %v776_v8 = vrot.slane %v775_v23, 1 }
 0x168   : > { %v919_v43 = vsel %vm918_vm9, %v916_v41, %v917_v60  ;;  %v928_v44 = vsel %vm927_vm10, %v925_v31, %v926_v20  ;;  %v752_v54 = vrot.slane %v751_v46, 1  ;;  %v784_v11 = vrot.slane %v783_v52, 1 }
 0x169   : > { %v929_v47 = vrot.slane %v928_v44, 2  ;;  %v920_v55 = vrot.slane %v919_v43, 1  ;;  %v745_v32 = vadd.f32 %v744_v48, %v743_v39  ;;  %v777_v16 = vadd.f32 %v776_v8, %v775_v23 }
 0x16a   : > { %v753_v57 = vadd.f32 %v752_v54, %v751_v46  ;;  %v785_v19 = vadd.f32 %v784_v11, %v783_v52 }
 0x16b   : > { %vm930_vm11 = vcmp.lt.s32.totalorder %v928_v44, %v929_v47  ;;  %1252 = vlog2.f32 %v745_v32  ;;  %vm921_vm12 = vcmp.lt.s32.totalorder %v919_v43, %v920_v55 }
 0x16c   : > { %v931_v45 = vsel %vm930_vm11, %v928_v44, %v929_v47  ;;  %1254 = vlog2.f32 %v753_v57  ;;  %v922_v5 = vsel %vm921_vm12, %v919_v43, %v920_v55 }
 0x16d   : > { %v932_v59 = vrot.slane %v931_v45, 1 }
 0x16f   : > { %vm933_vm15 = vcmp.lt.s32.totalorder %v931_v45, %v932_v59 }
 0x170   : > { %v934_v63 = vsel %vm933_vm15, %v931_v45, %v932_v59 }
 0x171   : > { %v935_v4 = vrot.slane %v934_v63, 7  ;;  %v1253_v9 = vpop.eup %1252 }
 0x172   : > { %v1255_v12 = vpop.eup %1254  ;;  %v755_v13 = vmul.f32 0.6931472, %v1253_v9 }
 0x173   : > { %v936_v10 = vsel %vm669_vm3, %v922_v5, %v935_v4  ;;  %v757_v14 = vmul.f32 0.6931472, %v1255_v12 }
 0x174   : > { %937 = vst.msk [vmem:[%s465_s22] sm:$0x3] %vm1566_vm13, %v936_v10  ;;  %v758_v15 = vadd.f32 %v755_v13, %v1528_v1  ;;  %vm480_vm13 = vcmask 0  }
 0x175   : > { %v759_v17 = vadd.f32 %v757_v14, %v1537_v7  ;;  %481 = vst.msk [vmem:[%s1638_s25] sm:$0x1] %vm480_vm13, %v1282_v53 }
 0x176   : > { %v791_v35 = vsub.f32 %v758_v15, %v777_v16  ;;  %482 = vst.msk [vmem:[%s1644_s28] sm:$0x1] %vm480_vm13, %v1282_v53 }
 0x177   : > { %v792_v42 = vsub.f32 %v759_v17, %v785_v19  ;;  %483 = vst.msk [vmem:[%s1650_s11] sm:$0x1] %vm480_vm13, %v1282_v53 }
 0x178   : > { %v798_v18 = vmul.f32 %v794_v3, %v791_v35 }
 0x179   : > { %v799_v50 = vmul.f32 %v795_v22, %v792_v42 }
 0x17a   : > { %v801_v24 = vsel %vm669_vm3, %v798_v18, 0.0 }
 0x17b   : > { %v802_v26 = vsel %vm669_vm3, %v799_v50, 0.0 }
 0x17c   : > { %v803_v27 = vadd.f32 %v802_v26, %v801_v24  ;;  %v800_v61 = vld [vmem:[%s1638_s25] sm:$0x1] }
 0x17d   : > { %v817_v20 = vld [vmem:[%s1644_s28] sm:$0x1] }
 0x17e   : > { %804 = vadd.xlane.f32.xlu0 %v803_v27  ;;  %v938_v39 = vld [vmem:[%s1650_s11] sm:$0x1] }
 0x1cd   : > { %v822_v1 = vpop.xlane.xlu1 %821 }
 0x1ce   : > { %v823_v21 = vrot.slane %v822_v1, 4 }
 0x1d0   : > { %v824_v22 = vadd.f32 %v823_v21, %v822_v1 }
 0x1d2   : > { %v825_v28 = vrot.slane %v824_v22, 2 }
 0x1d4   : > { %v826_v30 = vadd.f32 %v825_v28, %v824_v22 }
 0x1d6   : > { %v827_v41 = vrot.slane %v826_v30, 1 }
 0x1d8   : > { %v945_v7 = vpop.xlane.xlu2 %944  ;;  %v828_v60 = vadd.f32 %v827_v41, %v826_v30 }
 0x1d9   : > { %v946_v3 = vrot.slane %v945_v7, 4 }
 0x1db   : > { %v947_v37 = vadd.f32 %v946_v3, %v945_v7 }
 0x1dd   : > { %v948_v25 = vrot.slane %v947_v37, 2 }
 0x1df   : > { %v949_v36 = vadd.f32 %v948_v25, %v947_v37 }
 0x1e1   : > { %v950_v53 = vrot.slane %v949_v36, 1 }
 0x1e3   : > { %v951_v31 = vadd.f32 %v950_v53, %v949_v36 }
 0x1f1   : > { %v805_v0 = vpop.xlane.xlu0 %804 }
 0x1f2   : > { %v806_v40 = vrot.slane %v805_v0, 4 }
 0x1f4   : > { %v807_v29 = vadd.f32 %v806_v40, %v805_v0 }
 0x1f6   : > { %v808_v51 = vrot.slane %v807_v29, 2 }
 0x1f8   : > { %v809_v2 = vadd.f32 %v808_v51, %v807_v29 }
 0x1fa   : > { %v810_v58 = vrot.slane %v809_v2, 1 }
 0x1fc   : > { %v811_v62 = vadd.f32 %v810_v58, %v809_v2 }
 0x1fe   : > { %1204 = vpush %v811_v62 }
 0x1ff   : > { %1206 = vpush %v828_v60 }
 0x200   : > { %1208 = vpush %v951_v31 }
 0x22f   : > { %s1205_s13 = spop %1204 }
 0x230   : > { %v813_v6 = vstv %s1205_s13  ;;  %s1207_s12 = spop %1206 }
 0x231   : > { %v814_v33 = vadd.f32 %v813_v6, %v800_v61  ;;  %v830_v34 = vstv %s1207_s12  ;;  %s1209_s17 = spop %1208 }
 0x232   : > { %v831_v38 = vadd.f32 %v830_v34, %v817_v20  ;;  %s953_s18 = ssub.f32 0.0, %s1209_s17 }
 0x233   : > { %816 = vst.msk [vmem:[%s1638_s25] sm:$0x1] %vm480_vm13, %v814_v33 }
 0x234   : > { %832 = vst.msk [vmem:[%s1644_s28] sm:$0x1] %vm480_vm13, %v831_v38  ;;  %v954_v43 = vstv %s953_s18 }
 0x235   : > { %v955_v44 = vadd.f32 %v954_v43, %v938_v39 }
 0x237   : > { %956 = vst.msk [vmem:[%s1650_s11] sm:$0x1] %vm480_vm13, %v955_v44 }
 0x238 PF: > { %s21_s15 = sadd.s32 1, %s1278_s15   ;;  %s1704_s13 = smov %s1274_s14 }
 0x239   : > { %p18_p5 = scmp.ge.s32.totalorder %s21_s15, 4   ;;  %s1705_s14 = smov %s1707_s16 }
 0x23b   :  { %20 = sbr.rel (!%p18_p5) target bundleno = 2 (0x2), region = 129 }

</bundles_post_ra>
